<compile_context>
chip_gen: v7x
topology: tpu7x:2x2x1
jax: 0.10.0
libtpu: 0.0.40
codegen_flags: <defaults>
</compile_context>

<pallas_src>
import functools
from collections import namedtuple

import jax
import jax.numpy as jnp
from jax.experimental import pallas as pl
from jax.experimental.pallas import tpu as pltpu

DC = namedtuple("DatasetConfig", ["mean", "std", "input_size", "num_classes"])

DATASET_CONFIG = {
    "svhn": DC([0.4376821, 0.4437697, 0.47280442],
               [0.19803012, 0.20101562, 0.19703614], 32, 10),
    "cifar10": DC([0.49139968, 0.48215841, 0.44653091],
                  [0.24703223, 0.24348513, 0.26158784], 32, 10),
    "imagenet100": DC([0.485, 0.456, 0.406],
                      [0.229, 0.224, 0.225], 224, 100),
}

# Dense per-block target. 4 buffers (in + out, double-buffered) x 4 MiB =
# 16 MiB, which fits the explicit 32 MiB vmem_limit on every generation
# (v5e/v6e 128 MiB physical, v7x 64 MiB physical) with headroom.
_TARGET_BLOCK_BYTES = 4 << 20  # 4 MiB


def _attack_wrapper_kernel(x_ref, out_ref, *, std255, mean255,
                           inv_255_std, mean_over_std):
    """One grid step processes a (TB, HW) tile of a single channel.

    The channel index is the second grid axis, so per-channel dataset
    statistics reduce to a single scalar select (pure SREG work) that
    broadcasts over the dense (TB, HW) tile.
    """
    ch = pl.program_id(1)

    def sel(vals):
        # Scalar select of the per-channel compile-time constant.
        return jnp.where(ch == 0, vals[0],
                         jnp.where(ch == 1, vals[1], vals[2]))

    x = x_ref[...]  # (TB, HW) float32, fully lane/sublane dense

    # InverseDatasetTransform: (x * std + mean) * 255, constants pre-folded.
    pixel_img = x * sel(std255) + sel(mean255)

    # TODO(synk): AttackWrapper._forward is attack-subclass-specific (abstract
    # in the base class); identity stand-in here (pixel_ret == pixel_img).
    # An elementwise attack body should be fused right here to avoid an extra
    # full HBM read+write pass.
    pixel_ret = pixel_img

    # DatasetTransform: (pixel_ret / 255 - mean) / std, divisions folded into
    # multiplies by precomputed reciprocals.
    out_ref[...] = pixel_ret * sel(inv_255_std) - sel(mean_over_std)


def attack_wrapper_forward(img, dataset="cifar10"):
    """img: (N, 3, H, W) float32, already normalized ((x/255 - mean)/std)."""
    if dataset not in DATASET_CONFIG:
        raise ValueError("dataset name is invalid")
    cfg = DATASET_CONFIG[dataset]

    n, c, h, w = img.shape
    assert c == 3 and h == cfg.input_size and w == cfg.input_size

    hw = h * w                      # 1024 or 50176: multiple of 128 -> lane-dense
    x = img.reshape(n, c * hw)      # free contiguous view; channel in lane axis

    # Batch-tile size: ~4 MiB dense blocks of a single channel chunk.
    bytes_per_chunk = hw * img.dtype.itemsize    # one image's single-channel row
    tb = max(1, _TARGET_BLOCK_BYTES // bytes_per_chunk)
    tb = min(tb, n)
    if tb >= 8:
        tb = (tb // 8) * 8          # multiple of 8 -> dense sublanes
    # (if tb < 8 it equals n, which satisfies the "full array dim" rule)

    grid = (pl.cdiv(n, tb), c)      # channel as innermost grid axis (>=3 steps)

    mean = tuple(float(m) for m in cfg.mean)
    std = tuple(float(s) for s in cfg.std)
    kernel = functools.partial(
        _attack_wrapper_kernel,
        std255=tuple(s * 255.0 for s in std),
        mean255=tuple(m * 255.0 for m in mean),
        inv_255_std=tuple(1.0 / (255.0 * s) for s in std),
        mean_over_std=tuple(m / s for m, s in zip(mean, std)),
    )

    # Block (tb, hw): for grid point (b, j) it covers rows [b*tb, (b+1)*tb)
    # and lanes [j*hw, (j+1)*hw) of the flattened (N, 3*HW) image tensor,
    # i.e. exactly channel j of tb images.
    blk = pl.BlockSpec((tb, hw), lambda b, j: (b, j))

    out = pl.pallas_call(
        kernel,
        out_shape=jax.ShapeDtypeStruct((n, c * hw), img.dtype),
        grid_spec=pltpu.PrefetchScalarGridSpec(
            num_scalar_prefetch=0,
            grid=grid,
            in_specs=[blk],
            out_specs=blk,
        ),
        compiler_params=pltpu.CompilerParams(
            dimension_semantics=("parallel", "parallel"),
            vmem_limit_bytes=32 << 20,
        ),
    )(x)

    return out.reshape(n, c, h, w)


if __name__ == "__main__":
    key = jax.random.PRNGKey(0)
    # Small, module-consistent shape: batch=2, channels=3, spatial=32 (cifar10).
    img = jax.random.normal(key, (2, 3, 32, 32), dtype=jnp.float32)

    out = attack_wrapper_forward(img, dataset="cifar10")
    out = jax.block_until_ready(out)

    assert out.shape == img.shape and out.dtype == img.dtype

    # Reference: explicit denormalize -> (identity _forward) -> renormalize.
    cfg = DATASET_CONFIG["cifar10"]
    mean = jnp.asarray(cfg.mean, jnp.float32).reshape(1, 3, 1, 1)
    std = jnp.asarray(cfg.std, jnp.float32).reshape(1, 3, 1, 1)
    pixel = (img * std + mean) * 255.0
    ref = (pixel / 255.0 - mean) / std
    assert jnp.allclose(out, ref, atol=1e-4)

    # With identity _forward the roundtrip is numerically ~identity.
    assert jnp.allclose(out, img, atol=1e-3)

    print("KERNEL_OK")
</pallas_src>

<mosaic_0001>
module attributes {stable_mosaic.version = 11 : i64} {
  func.func @_attack_wrapper_kernel(%arg0: i32, %arg1: i32, %arg2: memref<2x1024xf32, #tpu.memory_space<vmem>>, %arg3: memref<2x1024xf32, #tpu.memory_space<vmem>>) attributes {dimension_semantics = [#tpu.dimension_semantics<parallel>, #tpu.dimension_semantics<parallel>], iteration_bounds = array<i64: 1, 3>, scalar_prefetch = 0 : i64, scratch_operands = 0 : i64, tpu.core_type = #tpu.core_type<tc>, window_params = [{transform_indices = @transform_0, window_bounds = array<i64: 2, 1024>}, {transform_indices = @transform_1, window_bounds = array<i64: 2, 1024>}]} {
    %c0 = arith.constant 0 : index
    %c0_0 = arith.constant 0 : index
    %0 = vector.load %arg2[%c0, %c0_0] : memref<2x1024xf32, #tpu.memory_space<vmem>>, vector<2x1024xf32>
    %c0_i32 = arith.constant 0 : i32
    %1 = arith.cmpi eq, %arg1, %c0_i32 : i32
    %c1_i32 = arith.constant 1 : i32
    %2 = arith.cmpi eq, %arg1, %c1_i32 : i32
    %cst = arith.constant 62.088707 : f32
    %cst_1 = arith.constant 6.670490e+01 : f32
    %3 = arith.select %2, %cst, %cst_1 : f32
    %cst_2 = arith.constant 62.9932175 : f32
    %4 = arith.select %1, %cst_2, %3 : f32
    %5 = vector.broadcast %4 : f32 to vector<2x1024xf32>
    %6 = arith.mulf %0, %5 : vector<2x1024xf32>
    %c0_i32_3 = arith.constant 0 : i32
    %7 = arith.cmpi eq, %arg1, %c0_i32_3 : i32
    %c1_i32_4 = arith.constant 1 : i32
    %8 = arith.cmpi eq, %arg1, %c1_i32_4 : i32
    %cst_5 = arith.constant 122.950394 : f32
    %cst_6 = arith.constant 113.865379 : f32
    %9 = arith.select %8, %cst_5, %cst_6 : f32
    %cst_7 = arith.constant 125.306915 : f32
    %10 = arith.select %7, %cst_7, %9 : f32
    %11 = vector.broadcast %10 : f32 to vector<2x1024xf32>
    %12 = arith.addf %6, %11 : vector<2x1024xf32>
    %c0_i32_8 = arith.constant 0 : i32
    %13 = arith.cmpi eq, %arg1, %c0_i32_8 : i32
    %c1_i32_9 = arith.constant 1 : i32
    %14 = arith.cmpi eq, %arg1, %c1_i32_9 : i32
    %cst_10 = arith.constant 0.016105989 : f32
    %cst_11 = arith.constant 0.0149914026 : f32
    %15 = arith.select %14, %cst_10, %cst_11 : f32
    %cst_12 = arith.constant 0.0158747248 : f32
    %16 = arith.select %13, %cst_12, %15 : f32
    %17 = vector.broadcast %16 : f32 to vector<2x1024xf32>
    %18 = arith.mulf %12, %17 : vector<2x1024xf32>
    %c0_i32_13 = arith.constant 0 : i32
    %19 = arith.cmpi eq, %arg1, %c0_i32_13 : i32
    %c1_i32_14 = arith.constant 1 : i32
    %20 = arith.cmpi eq, %arg1, %c1_i32_14 : i32
    %cst_15 = arith.constant 1.9802376 : f32
    %cst_16 = arith.constant 1.70700181 : f32
    %21 = arith.select %20, %cst_15, %cst_16 : f32
    %cst_17 = arith.constant 1.98921287 : f32
    %22 = arith.select %19, %cst_17, %21 : f32
    %23 = vector.broadcast %22 : f32 to vector<2x1024xf32>
    %24 = arith.subf %18, %23 : vector<2x1024xf32>
    %c0_18 = arith.constant 0 : index
    %c0_19 = arith.constant 0 : index
    %25 = vector.load %arg3[%c0_18, %c0_19] : memref<2x1024xf32, #tpu.memory_space<vmem>>, vector<2x1024xf32>
    tpu.vector_store %arg3[%c0_18, %c0_19], %24 {strides = array<i32>} : memref<2x1024xf32, #tpu.memory_space<vmem>>, vector<2x1024xf32>,
    return
  }
  func.func @transform_0(%arg0: i32, %arg1: i32) -> (i32, i32) {
    %c0_i32 = arith.constant 0 : i32
    return %arg0, %arg1 : i32, i32
  }
  func.func @transform_1(%arg0: i32, %arg1: i32) -> (i32, i32) {
    %c0_i32 = arith.constant 0 : i32
    return %arg0, %arg1 : i32, i32
  }
}

</mosaic_0001>

<bundles_post_ra>
// kernel: tpu_custom_call.1
= control target key start
LH: loop header
LB: loop body
LE: loop exit
PB: predicated region body
PF: predicated region fallthrough
CT: control target
= control target key end

     0   :  { %6 = vsyncpa [#allocation3], 0  ;;  %s665_s0 = inlined_call_operand.hbm [shape: f32[2,3072], index: 0, kind: input, shape index: {}]   ;;  %s666_s1 = inlined_call_operand.hbm [shape: f32[2,3072], index: 1, kind: output, shape index: {}]  }
   0x1   :  { %8 = vsyncpa [#allocation3 + $0x1], 0 }
   0x2   :  { %9 = vsyncpa [#allocation4], 0 }
   0x3   :  { %11 = vsyncpa [#allocation4 + $0x1], 0  ;;  %s485_s6 = smov 0   ;;  %s487_s7 = smov 0  }
   0x4   :  { %s489_s8 = smov 0   ;;  %s491_s9 = smov 0  }
   0x5   :  { %s493_s10 = smov 0   ;;  %s495_s11 = smov 0  }
   0x6 LB: > { %s280_s12 = sadd.s32 4294967295, %s471_s11   ;;  %s281_s13 = sadd.s32 4294967294, %s471_s11   ;;  %s471_s11 = sphi %s495_s11, %s17_s11   ;;  %s467_s10 = sphi %s493_s10, %s681_s10   ;;  %s463_s9 = sphi %s491_s9, %s680_s9   ;;  %s459_s8 = sphi %s489_s8, %s679_s8   ;;  %s455_s7 = sphi %s487_s7, %s678_s7   ;;  %s451_s6 = sphi %s485_s6, %s677_s6  }
   0x7   : > { %s26_s14 = sadd.s32 1, %s467_s10  ;;  %s38_s15 = sadd.s32 1, %s459_s8 }
   0x8   : > { %p27_p0 = scmp.ge.s32.totalorder %s26_s14, 3  ;;  %p45_p1 = scmp.ne.s32.totalorder %s459_s8, %s455_s7 }
   0x9   : > { %p46_p2 = scmp.eq.s32.totalorder %s471_s11, 0  ;;  %p51_p3 = scmp.ne.s32.totalorder %s455_s7, %s451_s6 }
   0xa   : > { %s683_s14 = smov (%p27_p0, %s26_s14), 0  ;;  %p52_p5 = scmp.eq.s32.totalorder %s280_s12, 0 }
   0xb   : > { %p526_p4 = por %p46_p2, %p45_p1  ;;  %s34_s17 = ssub.s32 %s467_s10, %s683_s14 }
   0xc   : > { %p77_p6 = scmp.eq.s32.totalorder %s280_s12, 2  ;;  %p36_p7 = scmp.eq.s32.totalorder %s34_s17, 0 }
   0xd   : > { %p532_p8 = por %p52_p5, %p51_p3  ;;  %p83_p10 = scmp.eq.s32.totalorder %s281_s13, 2 }
   0xe   : > { %p536_p9 = por %p77_p6, %p45_p1  ;;  %p309_p12 = scmp.lt.s32.totalorder %s471_s11, 3 }
   0xf   : > { %s541_s20 = scalar_select %p36_p7, %s459_s8, %s38_s15  }
  0x10   : > { %s670_s19 = scalar_select %p536_p9, 1, 0 }
  0x11   : > { %p543_p11 = por %p83_p10, %p51_p3  ;;  %s103_s22 = sand.u32 1, %s459_s8  }
  0x12   : > { %s284_s23 = sshll.u32 %s103_s22, 4  ;;  %s295_s24 = sshll.u32 %s467_s10, 8 }
  0x13   : > { %s671_s21 = scalar_select %p543_p11, 1, 0 }
  0x14   : > { %s553_s27 = scalar_lea.hbm %s665_s0, %s295_s24  ;;  %s107_s28 = scalar_lea.vmem [#allocation2], %s284_s23 }
  0x15   : > { %s117_s29 = sshll.u32 %s107_s28, 4  ;;  %p559_p13 = pnand %p309_p12, %p526_p4  ;;  %s555_s29 = int_to_ptr.vmem [resolvable:$true] %s117_s29 }
  0x16   : > { %s104_s2 = scalar_lea.sflag [#allocation3], %s103_s22  ;;  %s359_s3 = scalar_lea.hbm %s553_s27, 256 }
  0x17   : > { %p360_p2 = scmp.ne.s32.totalorder %s553_s27, %s359_s3  ;;  %p361_p3 = pneg %p559_p13 }
  0x18   : > { %s364_s12 = scalar_lea.hbm %s665_s0, 768  ;;  %p365_p4 = scmp.lt.u32.totalorder %s553_s27, %s665_s0 }
  0x19   : > { %p362_p5 = pnand %p361_p3, %p360_p2  ;;  %p366_p7 = scmp.lt.u32.totalorder %s364_s12, %s359_s3 }
  0x1a   : > { %p368_p12 = scmp.lt.u32.totalorder %s359_s3, %s553_s27 }
  0x1b   : > { %p363_p6 = pneg %p362_p5  ;;  %p367_p10 = por %p366_p7, %p365_p4 }
  0x1d   : > { %p369_p0 = por %p368_p12, %p367_p10 }
  0x1f   : > { %p370_p1 = pnand %p369_p0, %p363_p6 }
  0x21   : > { %373 = shalt.err (!%p370_p1)
}
  0x22   : > { %s374_s16 = scalar_lea.vmem %s555_s29, 256  ;;  %s473_s17 = smov [#allocation2]  }
  0x23   : > { %p375_p2 = scmp.ne.s32.totalorder %s555_s29, %s374_s16  ;;  %s379_s22 = sshll.u32 %s473_s17, 4  ;;  %s380_s22 = int_to_ptr.vmem [resolvable:$false] %s379_s22 }
  0x24   : > { %s381_s23 = scalar_lea.vmem %s380_s22, 512  ;;  %p382_p9 = scmp.lt.s32.totalorder %s555_s29, %s380_s22 }
  0x25   : > { %p377_p5 = pnand %p375_p2, %p361_p3  ;;  %p383_p4 = scmp.lt.s32.totalorder %s381_s23, %s374_s16 }
  0x27   : > { %p378_p11 = pneg %p377_p5  ;;  %p384_p7 = por %p383_p4, %p382_p9 }
  0x29   : > { %p385_p10 = pnand %p384_p7, %p378_p11 }
  0x2b   : > { %388 = shalt.err (!%p385_p10)
}
  0x2c   : > { %304 = dma.hbm_to_vmem [thread:$0]  (!%p559_p13), %s553_s27, 256, %s555_s29, %s104_s2  }
  0x2d   : > { %p673_p0 = scmp.lt.s32.totalorder %s471_s11, 4  ;;  %p674_p1 = scmp.ge.s32.totalorder %s471_s11, 1 }
  0x2f   : > { %p123_p3 = pnand %p674_p1, %p673_p0 }
  0x30   : > { %s595_s24 = sand.u32 (!%p123_p3), 1, %s455_s7  }
  0x31   : > { %126 = sbr.rel (%p123_p3) target bundleno = 90 (0x5a), region = 24  ;;  %s288_s25 = sshll.u32 (!%p123_p3), %s595_s24, 4 }
  0x32   : > { %s129_s26 = scalar_lea.sflag (!%p123_p3), [#allocation3], %s595_s24  ;;  %s132_s28 = scalar_lea.vmem (!%p123_p3), [#allocation2], %s288_s25 }
  0x38   : > { %442 = dma.done.wait (%p532_p8), %s129_s26, 256  }
  0x39   : > { %444 = vsyncadd (%p532_p8), %s129_s26, 4294967040  ;;  %p155_p9 = scmp.eq.s32.totalorder %s463_s9, 0  ;;  %p156_p11 = scmp.eq.s32.totalorder %s463_s9, 1  ;;  %v153_v0 = vld [vmem:[%s132_s28] sm:$0xff]  ;;  %v154_v2 = vld [vmem:[%s132_s28 + $0x8] sm:$0xff] }
  0x3a   : > { %s150_s27 = scalar_lea.vmem [#allocation5], %s288_s25  ;;  %s296_s4 = sshll.u32 %s463_s9, 8 }
  0x3b   : > { %s196_s29 = sshll.u32 %s150_s27, 4  ;;  %s619_s13 = scalar_lea.hbm %s666_s1, %s296_s4  ;;  %s614_s29 = int_to_ptr.vmem [resolvable:$true] %s196_s29 }
  0x3c   : > { %s157_s30 = scalar_select %p156_p11, 62.088707, 66.7049 }
  0x3d   : > { %s162_s2 = scalar_select %p156_p11, 122.95039, 113.86538 }
  0x3e   : > { %s685_s30 = smov (%p155_p9, %s157_s30), 62.993217  ;;  %s180_s15 = scalar_lea.sflag [#allocation4], %s595_s24 }
  0x3f   : > { %s687_s2 = smov (%p155_p9, %s162_s2), 125.306915  ;;  %v159_v1 = vstv %s685_s30  ;;  %s389_s16 = scalar_lea.vmem %s614_s29, 256 }
  0x40   : > { %s167_s18 = scalar_select %p156_p11, 0.016105989, 0.014991403  ;;  %v160_v3 = vmul.f32 %v159_v1, %v153_v0  ;;  %v164_v4 = vstv %s687_s2  ;;  %v161_v5 = vmul.f32 %v159_v1, %v154_v2 }
  0x41   : > { %s172_s3 = scalar_select %p156_p11, 1.9802376, 1.7070018 }
  0x42   : > { %s689_s18 = smov (%p155_p9, %s167_s18), 0.015874725  ;;  %v165_v6 = vadd.f32 %v164_v4, %v160_v3  ;;  %v166_v7 = vadd.f32 %v164_v4, %v161_v5  ;;  %p390_p8 = scmp.ne.s32.totalorder %s614_s29, %s389_s16 }
  0x43   : > { %s691_s3 = smov (%p155_p9, %s172_s3), 1.9892129  ;;  %v169_v8 = vstv %s689_s18  ;;  %p675_p13 = scmp.ne.s32.totalorder %s670_s19, 0 }
  0x44   : > { %v170_v9 = vmul.f32 %v169_v8, %v165_v6  ;;  %v174_v10 = vstv %s691_s3  ;;  %v171_v11 = vmul.f32 %v169_v8, %v166_v7  ;;  %s474_s9 = smov [#allocation5]  }
  0x45   : > { %p391_p6 = pnand %p390_p8, %p675_p13  ;;  %s393_s17 = sshll.u32 %s474_s9, 4  ;;  %s394_s17 = int_to_ptr.vmem [resolvable:$false] %s393_s17 }
  0x46   : > { %v175_v12 = vsub.f32 %v170_v9, %v174_v10  ;;  %v176_v13 = vsub.f32 %v171_v11, %v174_v10  ;;  %s395_s22 = scalar_lea.vmem %s394_s17, 512  ;;  %p396_p2 = scmp.lt.s32.totalorder %s614_s29, %s394_s17 }
  0x47   : > { %p392_p12 = pneg %p391_p6  ;;  %p397_p5 = scmp.lt.s32.totalorder %s395_s22, %s389_s16 }
  0x48   : > { %177 = vst [vmem:[%s150_s27] sm:$0xff] %v175_v12  ;;  %178 = vst [vmem:[%s150_s27 + $0x8] sm:$0xff] %v176_v13 }
  0x49   : > { %p398_p4 = por %p397_p5, %p396_p2 }
  0x4b   : > { %p399_p7 = pnand %p398_p4, %p392_p12 }
  0x4d   : > { %402 = shalt.err (!%p399_p7)
}
  0x4e   : > { %s403_s23 = scalar_lea.hbm %s619_s13, 256  ;;  %s407_s26 = scalar_lea.hbm %s666_s1, 768 }
  0x4f   : > { %p404_p10 = scmp.ne.s32.totalorder %s619_s13, %s403_s23  ;;  %p408_p3 = scmp.lt.u32.totalorder %s619_s13, %s666_s1 }
  0x50   : > { %p409_p9 = scmp.lt.u32.totalorder %s407_s26, %s403_s23  ;;  %p411_p8 = scmp.lt.u32.totalorder %s403_s23, %s619_s13 }
  0x51   : > { %p405_p0 = pnand %p404_p10, %p675_p13 }
  0x52   : > { %p410_p11 = por %p409_p9, %p408_p3 }
  0x53   : > { %p406_p1 = pneg %p405_p0 }
  0x54   : > { %p412_p6 = por %p411_p8, %p410_p11 }
  0x56   : > { %p413_p12 = pnand %p412_p6, %p406_p1 }
  0x58   : > { %416 = shalt.err (!%p413_p12)
}
  0x59   : > { %299 = dma.vmem_to_hbm [thread:$0]  (%p675_p13), %s614_s29, 256, %s619_s13, %s180_s15  }
  0x5a PF: > { %p310_p2 = scmp.ge.s32.totalorder %s471_s11, 2  ;;  %s208_s30 = sand.u32 1, %s451_s6  }
  0x5b   : > { %p676_p5 = scmp.ne.s32.totalorder %s671_s21, 0  ;;  %s209_s2 = scalar_lea.sflag [#allocation4], %s208_s30 }
  0x5d   : > { %p306_p4 = pnand %p310_p2, %p676_p5 }
  0x5f   : > { %446 = dma.done.wait (!%p306_p4), %s209_s2, 256  }
  0x60   : > { %448 = vsyncadd (!%p306_p4), %s209_s2, 4294967040  ;;  %s17_s11 = sadd.s32 1, %s471_s11   ;;  %s677_s6 = smov %s455_s7 }
  0x61   : > { %p14_p7 = scmp.ge.s32.totalorder %s17_s11, 5   ;;  %s678_s7 = smov %s459_s8 }
  0x62   : > { %s679_s8 = smov %s541_s20  ;;  %s680_s9 = smov %s467_s10 }
  0x63   : > { %s681_s10 = smov %s683_s14  ;;  %16 = sbr.rel (!%p14_p7) target bundleno = 6 (0x6), region = 69 }
  0x6a   :  { %214 = vsyncpa [#allocation3], 1 }
  0x6b   :  { %216 = vsyncpa [#allocation3 + $0x1], 1 }
  0x6c   :  { %217 = vsyncpa [#allocation4], 1 }
  0x6d   :  { %219 = vsyncpa [#allocation4 + $0x1], 1 }

</bundles_post_ra>
